<compile_context>
chip_gen: v7x
topology: tpu7x:2x2x1
jax: 0.10.0
libtpu: 0.0.40
codegen_flags: <defaults>
</compile_context>

<pallas_src>
import itertools
import math

import jax
import jax.numpy as jnp
from jax.experimental import pallas as pl
from jax.experimental.pallas import tpu as pltpu


_BASE_TILE = 512               # review: 512-1024 tiles reach ~85% of HBM roofline
_TARGET_BLOCK_BYTES = 2 << 20  # per-block budget; in+out double-buffered ~8 MiB
_IDENTITY4 = (0, 1, 2, 3)


def _round_up(v, m):
    return ((v + m - 1) // m) * m


def _padded_block_bytes(sub, lane, itemsize):
    # VMEM footprint of a (..., sub, lane) block under (8, 128) tiling.
    return _round_up(sub, 8) * _round_up(lane, 128) * itemsize


def _cparams(n_grid_axes, *padded_block_bytes):
    # Every grid axis here is independent -> all "parallel" (lets v7x shard the
    # grid across its 2 TensorCores; free on single-core v5e/v6e).
    need = 2 * sum(padded_block_bytes)            # double-buffered in + out
    limit = int(min(48 << 20, max(2 * need, 16 << 20)))
    return pltpu.CompilerParams(
        dimension_semantics=("parallel",) * n_grid_axes,
        vmem_limit_bytes=limit)


def _pick_tiles(M, N, itemsize):
    """Tile sizes for an (M, N) -> (N, M) tiled transpose.

    Start from 512 (full extent when smaller) and grow toward ~2 MiB per block.
    Grown tiles stay multiples of 512 (so (8,128)-legal) unless they hit the full
    extent (always a legal block dim).  When one dim is small the partner tile
    grows so each grid step still moves a large contiguous HBM run instead of
    being dominated by the fixed per-step overhead.
    """
    TM = M if M <= _BASE_TILE else _BASE_TILE
    TN = N if N <= _BASE_TILE else _BASE_TILE

    def fits(tm, tn):
        in_b = _padded_block_bytes(tm, tn, itemsize)   # block (..., TM, TN)
        out_b = _padded_block_bytes(tn, tm, itemsize)  # block (..., TN, TM)
        return max(in_b, out_b) <= _TARGET_BLOCK_BYTES

    def grow(t, extent, partner, t_is_m):
        while t < extent:
            nxt = extent if extent <= 2 * t else 2 * t
            tm, tn = (nxt, partner) if t_is_m else (partner, nxt)
            if not fits(tm, tn):
                break
            t = nxt
        return t

    if TM <= TN:                       # grow the dim paired with the smaller one
        TN = grow(TN, N, TM, t_is_m=False)
        TM = grow(TM, M, TN, t_is_m=True)
    else:
        TM = grow(TM, M, TN, t_is_m=True)
        TN = grow(TN, N, TM, t_is_m=False)
    return TM, TN


# ----------------------------------------------------------------------------
# Kernels
# ----------------------------------------------------------------------------
def _transpose2_kernel(x_ref, o_ref):
    # (TM, TN) -> (TN, TM)
    o_ref[...] = x_ref[...].T


def _transpose3_kernel(x_ref, o_ref):
    # (1, TM, TN) -> (1, TN, TM)
    o_ref[0] = x_ref[0].T


def _transpose4_kernel(x_ref, o_ref):
    # (1, 1, TM, TN) -> (1, 1, TN, TM)
    o_ref[0, 0] = x_ref[0, 0].T


def _lead_swap_copy_kernel(x_ref, o_ref):
    # (1, TB, TH, W) -> (TB, 1, TH, W): identical flat layout (leading dims only),
    # so this lowers to a plain VMEM copy.
    o_ref[...] = x_ref[...].reshape(o_ref.shape)


# ----------------------------------------------------------------------------
# Tiled pass wrappers
# ----------------------------------------------------------------------------
def _transpose_2d(x2):
    """(M, N) -> (N, M) tiled transpose."""
    M, N = x2.shape
    itemsize = x2.dtype.itemsize
    TM, TN = _pick_tiles(M, N, itemsize)
    # Mi innermost: consecutive grid steps write lane-adjacent output tiles.
    grid = (pl.cdiv(N, TN), pl.cdiv(M, TM))
    return pl.pallas_call(
        _transpose2_kernel,
        out_shape=jax.ShapeDtypeStruct((N, M), x2.dtype),
        grid=grid,
        in_specs=[pl.BlockSpec((TM, TN), lambda j, i: (i, j))],
        out_specs=pl.BlockSpec((TN, TM), lambda j, i: (j, i)),
        compiler_params=_cparams(
            2,
            _padded_block_bytes(TM, TN, itemsize),
            _padded_block_bytes(TN, TM, itemsize)),
    )(x2)


def _batched_transpose_3d(x3):
    """(A, M, N) -> (A, N, M) tiled transpose (A > 1)."""
    A, M, N = x3.shape
    itemsize = x3.dtype.itemsize
    TM, TN = _pick_tiles(M, N, itemsize)
    grid = (A, pl.cdiv(N, TN), pl.cdiv(M, TM))
    return pl.pallas_call(
        _transpose3_kernel,
        out_shape=jax.ShapeDtypeStruct((A, N, M), x3.dtype),
        grid=grid,
        in_specs=[pl.BlockSpec((1, TM, TN), lambda a, j, i: (a, i, j))],
        out_specs=pl.BlockSpec((1, TN, TM), lambda a, j, i: (a, j, i)),
        compiler_params=_cparams(
            3,
            _padded_block_bytes(TM, TN, itemsize),
            _padded_block_bytes(TN, TM, itemsize)),
    )(x3)


def _swapped_batch_transpose_4d(x4):
    """(B0, B1, M, N) -> (B1, B0, N, M): perm (1,0,3,2) in one tiled pass."""
    B0, B1, M, N = x4.shape
    itemsize = x4.dtype.itemsize
    TM, TN = _pick_tiles(M, N, itemsize)
    grid = (B1, B0, pl.cdiv(N, TN), pl.cdiv(M, TM))
    return pl.pallas_call(
        _transpose4_kernel,
        out_shape=jax.ShapeDtypeStruct((B1, B0, N, M), x4.dtype),
        grid=grid,
        in_specs=[pl.BlockSpec((1, 1, TM, TN),
                               lambda b1, b0, j, i: (b0, b1, i, j))],
        out_specs=pl.BlockSpec((1, 1, TN, TM),
                               lambda b1, b0, j, i: (b1, b0, j, i)),
        compiler_params=_cparams(
            4,
            _padded_block_bytes(TM, TN, itemsize),
            _padded_block_bytes(TN, TM, itemsize)),
    )(x4)


def _leading_swap_copy_4d(x4):
    """(B0, B1, H, W) -> (B1, B0, H, W): perm (1,0,2,3).

    The trailing (H, W) slab is unchanged, so this is a blocked copy.  TB leading
    rows are batched per grid step (one tiny slab per step would be dominated by
    the ~0.35 us per-step overhead); H is tiled as well so huge spatial slabs
    never overflow VMEM.
    """
    B0, B1, H, W = x4.shape
    itemsize = x4.dtype.itemsize
    if _padded_block_bytes(H, W, itemsize) <= _TARGET_BLOCK_BYTES:
        TH = H
    else:
        # TODO(synk): a W so large that a single 8-row strip exceeds the budget is
        # not tiled further (would also need a W grid axis).
        strip = _padded_block_bytes(8, W, itemsize)
        TH = min(8 * max(1, _TARGET_BLOCK_BYTES // strip), H)
    slab = _padded_block_bytes(TH, W, itemsize)
    TB = int(max(1, min(B1, _TARGET_BLOCK_BYTES // slab)))
    grid = (B0, pl.cdiv(B1, TB), pl.cdiv(H, TH))
    blk = TB * slab
    return pl.pallas_call(
        _lead_swap_copy_kernel,
        out_shape=jax.ShapeDtypeStruct((B1, B0, H, W), x4.dtype),
        grid=grid,
        in_specs=[pl.BlockSpec((1, TB, TH, W), lambda a, b, h: (a, b, h, 0))],
        out_specs=pl.BlockSpec((TB, 1, TH, W), lambda a, b, h: (b, a, h, 0)),
        compiler_params=_cparams(3, blk, blk),
    )(x4)


# ----------------------------------------------------------------------------
# Permutation dispatch
# ----------------------------------------------------------------------------
def _merge_runs(perm):
    """Merge input axes that stay contiguous and in-order under `perm`.
    Returns (groups_in_input_order, group_perm) such that the permute equals
    transpose(reshape(x, group_sizes), group_perm) plus free reshapes."""
    runs = [[perm[0]]]
    for p in perm[1:]:
        if p == runs[-1][-1] + 1:
            runs[-1].append(p)
        else:
            runs.append([p])
    order = sorted(range(len(runs)), key=lambda r: runs[r][0])  # output-run -> rank
    rank = {r: k for k, r in enumerate(order)}
    groups = [runs[r] for r in order]                           # input order
    group_perm = tuple(rank[r] for r in range(len(runs)))       # output order
    return groups, group_perm


def _is_single_pass(perm):
    if perm == _IDENTITY4:
        return True
    _, gperm = _merge_runs(perm)
    return gperm in ((1, 0), (0, 2, 1)) or perm in ((1, 0, 2, 3), (1, 0, 3, 2))


def _single_pass(x, perm):
    """Apply `perm` in one tiled Pallas pass; returns None if not supported."""
    s = x.shape
    out_shape = tuple(s[p] for p in perm)
    if perm == _IDENTITY4:
        return x
    groups, gperm = _merge_runs(perm)
    gsizes = [math.prod(s[a] for a in g) for g in groups]
    if gperm == (1, 0):
        return _transpose_2d(x.reshape(gsizes[0], gsizes[1])).reshape(out_shape)
    if gperm == (0, 2, 1):
        A, M, N = gsizes
        if A == 1:   # drop the unit batch axis (balanced grid split on v7x)
            return _transpose_2d(x.reshape(M, N)).reshape(out_shape)
        return _batched_transpose_3d(x.reshape(A, M, N)).reshape(out_shape)
    if perm == (1, 0, 2, 3):
        return _leading_swap_copy_4d(x)
    if perm == (1, 0, 3, 2):
        return _swapped_batch_transpose_4d(x)
    return None


def pallas_permute4(x, perm):
    """torch.permute(x, perm) for a 4-D tensor, via Pallas TPU kernels."""
    perm = tuple(int(p) for p in perm)
    if x.ndim != 4 or sorted(perm) != [0, 1, 2, 3]:
        raise ValueError(f"expected a 4-D input and a permutation of (0,1,2,3); "
                         f"got shape={x.shape}, perm={perm}")
    out_shape = tuple(x.shape[p] for p in perm)

    # A permute that preserves the relative order of all non-unit axes is a pure
    # (free) reshape: no data movement, no kernel.
    if ([a for a in range(4) if x.shape[a] > 1]
            == [a for a in perm if x.shape[a] > 1]):
        return x.reshape(out_shape)

    y = _single_pass(x, perm)
    if y is not None:
        return y

    # Exotic permutation (e.g. (3,2,1,0)): decompose into two supported tiled
    # passes  y = transpose(transpose(x, q), r)  with  q[r[i]] == perm[i].
    for q in itertools.permutations(range(4)):
        if q == _IDENTITY4 or not _is_single_pass(q):
            continue
        qinv = [0] * 4
        for pos, ax in enumerate(q):
            qinv[ax] = pos
        r = tuple(qinv[p] for p in perm)
        if r != _IDENTITY4 and _is_single_pass(r):
            return _single_pass(_single_pass(x, q), r)

    # Backstop (not reached for 4-D perms in practice): realize the permutation
    # as a chain of "move one axis to the end" passes, each a tiled transpose.
    cur, y = list(range(4)), x
    for ax in perm:
        j = cur.index(ax)
        move = tuple(i for i in range(4) if i != j) + (j,)
        y = _single_pass(y, move)
        cur = [cur[i] for i in move]
    return y


class PermuteChannels:
    """JAX/Pallas equivalent of the torch `permute_channels` module."""

    def __init__(self, B, C, H, W):
        self.perm = (B, C, H, W)

    def __call__(self, x):
        return pallas_permute4(x, self.perm)


# ----------------------------------------------------------------------------
if __name__ == "__main__":
    key = jax.random.PRNGKey(0)
    tests = [
        ((2, 128, 16, 16), (0, 2, 3, 1)),   # NCHW -> NHWC (canonical channel permute)
        ((2, 16, 16, 128), (0, 3, 1, 2)),   # NHWC -> NCHW
        ((2, 4, 128, 128), (0, 1, 3, 2)),   # minor-axis swap (merged batched transpose)
        ((2, 4, 16, 128), (1, 0, 2, 3)),    # leading swap (batched blocked copy)
        ((2, 4, 128, 128), (1, 0, 3, 2)),   # leading + minor swap (4-D tiled pass)
        ((1, 4, 24, 250), (0, 2, 3, 1)),    # small channels + non-multiple-of-tile edge
        ((2, 4, 8, 128), (3, 2, 1, 0)),     # exotic perm -> two-pass decomposition
    ]

    for shape, perm in tests:
        key, sub = jax.random.split(key)
        x = jax.random.normal(sub, shape, jnp.float32)
        y = jax.block_until_ready(PermuteChannels(*perm)(x))
        ref = jnp.transpose(x, perm)
        assert y.shape == ref.shape, (perm, shape, y.shape, ref.shape)
        assert bool(jnp.array_equal(y, ref)), f"mismatch for perm={perm}, shape={shape}"

    print("KERNEL_OK")
</pallas_src>

<mosaic_0001>
module attributes {stable_mosaic.version = 11 : i64} {
  func.func @_transpose3_kernel(%arg0: i32, %arg1: i32, %arg2: i32, %arg3: memref<1x128x256xf32, #tpu.memory_space<vmem>>, %arg4: memref<1x256x128xf32, #tpu.memory_space<vmem>>) attributes {dimension_semantics = [#tpu.dimension_semantics<parallel>, #tpu.dimension_semantics<parallel>, #tpu.dimension_semantics<parallel>], iteration_bounds = array<i64: 2, 1, 1>, scalar_prefetch = 0 : i64, scratch_operands = 0 : i64, tpu.core_type = #tpu.core_type<tc>, window_params = [{transform_indices = @transform_0, window_bounds = array<i64: 1, 128, 256>}, {transform_indices = @transform_1, window_bounds = array<i64: 1, 256, 128>}]} {
    %c0 = arith.constant 0 : index
    %c0_0 = arith.constant 0 : index
    %c0_1 = arith.constant 0 : index
    %0 = vector.load %arg3[%c0, %c0_0, %c0_1] : memref<1x128x256xf32, #tpu.memory_space<vmem>>, vector<1x128x256xf32>
    %1 = vector.shape_cast %0 : vector<1x128x256xf32> to vector<128x256xf32>
    %2 = tpu.transpose %1, [1, 0] : vector<128x256xf32> -> vector<256x128xf32>
    %c0_2 = arith.constant 0 : index
    %c0_3 = arith.constant 0 : index
    %c0_4 = arith.constant 0 : index
    %3 = vector.load %arg4[%c0_2, %c0_3, %c0_4] : memref<1x256x128xf32, #tpu.memory_space<vmem>>, vector<1x256x128xf32>
    %4 = vector.shape_cast %3 : vector<1x256x128xf32> to vector<256x128xf32>
    %5 = vector.shape_cast %2 : vector<256x128xf32> to vector<1x256x128xf32>
    tpu.vector_store %arg4[%c0_2, %c0_3, %c0_4], %5 {strides = array<i32>} : memref<1x256x128xf32, #tpu.memory_space<vmem>>, vector<1x256x128xf32>,
    return
  }
  func.func @transform_0(%arg0: i32, %arg1: i32, %arg2: i32) -> (i32, i32, i32) {
    %c0_i32 = arith.constant 0 : i32
    return %arg0, %arg2, %arg1 : i32, i32, i32
  }
  func.func @transform_1(%arg0: i32, %arg1: i32, %arg2: i32) -> (i32, i32, i32) {
    %c0_i32 = arith.constant 0 : i32
    return %arg0, %arg1, %arg2 : i32, i32, i32
  }
}

</mosaic_0001>

<bundles_post_ra>
// kernel: tpu_custom_call.1
= control target key start
LH: loop header
LB: loop body
LE: loop exit
PB: predicated region body
PF: predicated region fallthrough
CT: control target
= control target key end

     0   :  { %6 = vsyncpa [#allocation3], 0  ;;  %s869_s0 = inlined_call_operand.hbm [shape: f32[2,128,256], index: 0, kind: input, shape index: {}]   ;;  %s870_s1 = inlined_call_operand.hbm [shape: f32[2,256,128], index: 1, kind: output, shape index: {}]  }
   0x1   :  { %8 = vsyncpa [#allocation3 + $0x1], 0 }
   0x2   :  { %9 = vsyncpa [#allocation4], 0 }
   0x3   :  { %11 = vsyncpa [#allocation4 + $0x1], 0  ;;  %s621_s6 = smov 0   ;;  %s623_s7 = smov 0  }
   0x4   :  { %s625_s8 = smov 0   ;;  %s627_s9 = smov 0  }
   0x5   :  { %s629_s10 = smov 0   ;;  %s631_s11 = smov 0  }
   0x6 LB: > { %s408_s12 = sadd.s32 4294967295, %s603_s11   ;;  %s409_s13 = sadd.s32 4294967294, %s603_s11   ;;  %s603_s11 = sphi %s631_s11, %s17_s11   ;;  %s599_s10 = sphi %s629_s10, %s885_s10   ;;  %s595_s9 = sphi %s627_s9, %s884_s9   ;;  %s591_s8 = sphi %s625_s8, %s883_s8   ;;  %s587_s7 = sphi %s623_s7, %s882_s7   ;;  %s583_s6 = sphi %s621_s6, %s881_s6  }
   0x7   : > { %s36_s14 = sadd.s32 1, %s599_s10  ;;  %s47_s15 = sadd.s32 1, %s591_s8 }
   0x8   : > { %p38_p0 = scmp.ge.s32.totalorder %s36_s14, 2  ;;  %p54_p1 = scmp.ne.s32.totalorder %s591_s8, %s587_s7 }
   0x9   : > { %p55_p2 = scmp.eq.s32.totalorder %s603_s11, 0  ;;  %p60_p3 = scmp.ne.s32.totalorder %s587_s7, %s583_s6 }
   0xa   : > { %s887_s14 = smov (%p38_p0, %s36_s14), 0  ;;  %p61_p5 = scmp.eq.s32.totalorder %s408_s12, 0 }
   0xb   : > { %p662_p4 = por %p55_p2, %p54_p1  ;;  %s40_s17 = ssub.s32 %s599_s10, %s887_s14 }
   0xc   : > { %p88_p6 = scmp.eq.s32.totalorder %s408_s12, 1  ;;  %p45_p7 = scmp.eq.s32.totalorder %s40_s17, 0 }
   0xd   : > { %p668_p8 = por %p61_p5, %p60_p3  ;;  %p94_p10 = scmp.eq.s32.totalorder %s409_s13, 1 }
   0xe   : > { %p672_p9 = por %p88_p6, %p54_p1  ;;  %p437_p13 = scmp.lt.s32.totalorder %s603_s11, 2 }
   0xf   : > { %s677_s20 = scalar_select %p45_p7, %s591_s8, %s47_s15  }
  0x10   : > { %s874_s19 = scalar_select %p672_p9, 1, 0 }
  0x11   : > { %p679_p11 = por %p94_p10, %p60_p3  ;;  %s114_s22 = sand.u32 1, %s591_s8  }
  0x12   : > { %s412_s23 = sshll.u32 %s114_s22, 8  ;;  %s423_s24 = sshll.u32 %s599_s10, 12 }
  0x13   : > { %s875_s21 = scalar_select %p679_p11, 1, 0 }
  0x14   : > { %s690_s27 = scalar_lea.hbm %s869_s0, %s423_s24  ;;  %s118_s28 = scalar_lea.vmem [#allocation2], %s412_s23 }
  0x15   : > { %s130_s29 = sshll.u32 %s118_s28, 4  ;;  %p696_p0 = pnand %p437_p13, %p662_p4  ;;  %s692_s29 = int_to_ptr.vmem [resolvable:$true] %s130_s29 }
  0x16   : > { %s701_s2 = scalar_lea.sflag [#allocation3], %s114_s22  ;;  %s491_s3 = scalar_lea.hbm %s690_s27, 4096 }
  0x17   : > { %p492_p2 = scmp.ne.s32.totalorder %s690_s27, %s491_s3  ;;  %p493_p3 = pneg %p696_p0 }
  0x18   : > { %s496_s12 = scalar_lea.hbm %s869_s0, 8192  ;;  %p497_p4 = scmp.lt.u32.totalorder %s690_s27, %s869_s0 }
  0x19   : > { %p494_p5 = pnand %p493_p3, %p492_p2  ;;  %p498_p7 = scmp.lt.u32.totalorder %s496_s12, %s491_s3 }
  0x1a   : > { %p500_p13 = scmp.lt.u32.totalorder %s491_s3, %s690_s27 }
  0x1b   : > { %p495_p6 = pneg %p494_p5  ;;  %p499_p10 = por %p498_p7, %p497_p4 }
  0x1d   : > { %p501_p12 = por %p500_p13, %p499_p10 }
  0x1f   : > { %p502_p1 = pnand %p501_p12, %p495_p6 }
  0x21   : > { %505 = shalt.err (!%p502_p1)
}
  0x22   : > { %s506_s16 = scalar_lea.vmem %s692_s29, 4096  ;;  %s605_s17 = smov [#allocation2]  }
  0x23   : > { %p507_p2 = scmp.ne.s32.totalorder %s692_s29, %s506_s16  ;;  %s511_s22 = sshll.u32 %s605_s17, 4  ;;  %s512_s22 = int_to_ptr.vmem [resolvable:$false] %s511_s22 }
  0x24   : > { %s513_s23 = scalar_lea.vmem %s512_s22, 8192  ;;  %p514_p9 = scmp.lt.s32.totalorder %s692_s29, %s512_s22 }
  0x25   : > { %p509_p5 = pnand %p507_p2, %p493_p3  ;;  %p515_p4 = scmp.lt.s32.totalorder %s513_s23, %s506_s16 }
  0x27   : > { %p510_p11 = pneg %p509_p5  ;;  %p516_p7 = por %p515_p4, %p514_p9 }
  0x29   : > { %p517_p10 = pnand %p516_p7, %p510_p11 }
  0x2b   : > { %520 = shalt.err (!%p517_p10)
}
  0x2c   : > { %s606_s24 = smov 256   ;;  %s607_s25 = smov 16  }
  0x2d   : > { %432 = dma.hbm_to_vmem [thread:$0]  (!%p696_p0), %s690_s27, 4096, %s692_s29, %s701_s2, %s606_s24, %s606_s24, %s607_s25  }
  0x2e   : > { %p138_p12 = scmp.lt.s32.totalorder %s603_s11, 3  ;;  %p877_p1 = scmp.ge.s32.totalorder %s603_s11, 1 }
  0x30   : > { %p139_p3 = pnand %p877_p1, %p138_p12 }
  0x31   : > { %s733_s26 = sand.u32 (!%p139_p3), 1, %s587_s7  }
  0x32   : > { %142 = sbr.rel (%p139_p3) target bundleno = 263 (0x107), region = 24  ;;  %s416_s28 = sshll.u32 (!%p139_p3), %s733_s26, 8 }
  0x33   : > { %s145_s3 = scalar_lea.sflag (!%p139_p3), [#allocation3], %s733_s26  ;;  %s739_s4 = scalar_lea.vmem (!%p139_p3), [#allocation2], %s416_s28 }
  0x39   : > { %574 = dma.done.wait (%p668_p8), %s145_s3, 4096  }
  0x3a   : > { %576 = vsyncadd (%p668_p8), %s145_s3, 4294963200  ;;  %v171_v0 = vld [vmem:[%s739_s4 + $0x8] sm:$0xff]  ;;  %v170_v1 = vld [vmem:[%s739_s4] sm:$0xff]  ;;  %s779_s18 = scalar_lea.vmem [#allocation5], %s416_s28  ;;  %s424_s27 = sshll.u32 %s595_s9, 12 }
  0x3b   : > { %234 = vxpose.xlu1.b32.start [1/16] %v171_v0, 128  ;;  %202 = vxpose.xlu0.b32.start [1/16] %v170_v1, 128  ;;  %v173_v2 = vld [vmem:[%s739_s4 + $0x18] sm:$0xff]  ;;  %v172_v3 = vld [vmem:[%s739_s4 + $0x10] sm:$0xff]  ;;  %v175_v4 = vld [vmem:[%s739_s4 + $0x28] sm:$0xff]  ;;  %s315_s29 = sshll.u32 %s779_s18, 4  ;;  %s816_s5 = scalar_lea.hbm %s870_s1, %s424_s27  ;;  %s818_s29 = int_to_ptr.vmem [resolvable:$true] %s315_s29 }
  0x3c   : > { %v174_v5 = vld [vmem:[%s739_s4 + $0x20] sm:$0xff]  ;;  %v177_v6 = vld [vmem:[%s739_s4 + $0x38] sm:$0xff]  ;;  %v176_v7 = vld [vmem:[%s739_s4 + $0x30] sm:$0xff]  ;;  %s299_s9 = scalar_lea.sflag [#allocation4], %s733_s26  ;;  %s521_s12 = scalar_lea.vmem %s818_s29, 4096 }
  0x3d   : > { %v179_v8 = vld [vmem:[%s739_s4 + $0x48] sm:$0xff]  ;;  %v178_v9 = vld [vmem:[%s739_s4 + $0x40] sm:$0xff]  ;;  %v181_v10 = vld [vmem:[%s739_s4 + $0x58] sm:$0xff]  ;;  %p522_p8 = scmp.ne.s32.totalorder %s818_s29, %s521_s12  ;;  %p878_p9 = scmp.ne.s32.totalorder %s874_s19, 0 }
  0x3e   : > { %v180_v11 = vld [vmem:[%s739_s4 + $0x50] sm:$0xff]  ;;  %v183_v12 = vld [vmem:[%s739_s4 + $0x68] sm:$0xff]  ;;  %v182_v13 = vld [vmem:[%s739_s4 + $0x60] sm:$0xff]  ;;  %s608_s13 = smov [#allocation5]  }
  0x3f   : > { %235 = vxpose.xlu1.b32.cont [2/16] %v173_v2, 128  ;;  %203 = vxpose.xlu0.b32.cont [2/16] %v172_v3, 128  ;;  %v185_v14 = vld [vmem:[%s739_s4 + $0x78] sm:$0xff]  ;;  %v184_v15 = vld [vmem:[%s739_s4 + $0x70] sm:$0xff]  ;;  %v187_v16 = vld [vmem:[%s739_s4 + $0x88] sm:$0xff]  ;;  %p523_p11 = pnand %p522_p8, %p878_p9  ;;  %s525_s15 = sshll.u32 %s608_s13, 4  ;;  %s526_s15 = int_to_ptr.vmem [resolvable:$false] %s525_s15 }
  0x40   : > { %v186_v17 = vld [vmem:[%s739_s4 + $0x80] sm:$0xff]  ;;  %v189_v18 = vld [vmem:[%s739_s4 + $0x98] sm:$0xff]  ;;  %v188_v19 = vld [vmem:[%s739_s4 + $0x90] sm:$0xff]  ;;  %s527_s16 = scalar_lea.vmem %s526_s15, 8192  ;;  %p528_p6 = scmp.lt.s32.totalorder %s818_s29, %s526_s15 }
  0x41   : > { %v191_v20 = vld [vmem:[%s739_s4 + $0xa8] sm:$0xff]  ;;  %v190_v21 = vld [vmem:[%s739_s4 + $0xa0] sm:$0xff]  ;;  %v193_v22 = vld [vmem:[%s739_s4 + $0xb8] sm:$0xff]  ;;  %p524_p0 = pneg %p523_p11  ;;  %p529_p13 = scmp.lt.s32.totalorder %s527_s16, %s521_s12 }
  0x42   : > { %v192_v23 = vld [vmem:[%s739_s4 + $0xb0] sm:$0xff]  ;;  %v195_v24 = vld [vmem:[%s739_s4 + $0xc8] sm:$0xff]  ;;  %v194_v25 = vld [vmem:[%s739_s4 + $0xc0] sm:$0xff] }
  0x43   : > { %236 = vxpose.xlu1.b32.cont [3/16] %v175_v4, 128  ;;  %204 = vxpose.xlu0.b32.cont [3/16] %v174_v5, 128  ;;  %v197_v26 = vld [vmem:[%s739_s4 + $0xd8] sm:$0xff]  ;;  %v196_v27 = vld [vmem:[%s739_s4 + $0xd0] sm:$0xff]  ;;  %v199_v28 = vld [vmem:[%s739_s4 + $0xe8] sm:$0xff]  ;;  %p530_p2 = por %p529_p13, %p528_p6 }
  0x44   : > { %v198_v29 = vld [vmem:[%s739_s4 + $0xe0] sm:$0xff]  ;;  %v201_v30 = vld [vmem:[%s739_s4 + $0xf8] sm:$0xff]  ;;  %v200_v31 = vld [vmem:[%s739_s4 + $0xf0] sm:$0xff] }
  0x45   : > { %p531_p5 = pnand %p530_p2, %p524_p0 }
  0x47   : > { %237 = vxpose.xlu1.b32.cont [4/16] %v177_v6, 128  ;;  %205 = vxpose.xlu0.b32.cont [4/16] %v176_v7, 128 }
  0x4b   : > { %238 = vxpose.xlu1.b32.cont [5/16] %v179_v8, 128  ;;  %206 = vxpose.xlu0.b32.cont [5/16] %v178_v9, 128 }
  0x4f   : > { %239 = vxpose.xlu1.b32.cont [6/16] %v181_v10, 128  ;;  %207 = vxpose.xlu0.b32.cont [6/16] %v180_v11, 128 }
  0x53   : > { %240 = vxpose.xlu1.b32.cont [7/16] %v183_v12, 128  ;;  %208 = vxpose.xlu0.b32.cont [7/16] %v182_v13, 128 }
  0x57   : > { %241 = vxpose.xlu1.b32.cont [8/16] %v185_v14, 128  ;;  %209 = vxpose.xlu0.b32.cont [8/16] %v184_v15, 128 }
  0x5b   : > { %242 = vxpose.xlu1.b32.cont [9/16] %v187_v16, 128  ;;  %210 = vxpose.xlu0.b32.cont [9/16] %v186_v17, 128 }
  0x5f   : > { %243 = vxpose.xlu1.b32.cont [10/16] %v189_v18, 128  ;;  %211 = vxpose.xlu0.b32.cont [10/16] %v188_v19, 128 }
  0x63   : > { %244 = vxpose.xlu1.b32.cont [11/16] %v191_v20, 128  ;;  %212 = vxpose.xlu0.b32.cont [11/16] %v190_v21, 128 }
  0x67   : > { %245 = vxpose.xlu1.b32.cont [12/16] %v193_v22, 128  ;;  %213 = vxpose.xlu0.b32.cont [12/16] %v192_v23, 128 }
  0x6b   : > { %246 = vxpose.xlu1.b32.cont [13/16] %v195_v24, 128  ;;  %214 = vxpose.xlu0.b32.cont [13/16] %v194_v25, 128 }
  0x6f   : > { %247 = vxpose.xlu1.b32.cont [14/16] %v197_v26, 128  ;;  %215 = vxpose.xlu0.b32.cont [14/16] %v196_v27, 128 }
  0x73   : > { %248 = vxpose.xlu1.b32.cont [15/16] %v199_v28, 128  ;;  %216 = vxpose.xlu0.b32.cont [15/16] %v198_v29, 128 }
  0x77   : > { %249 = vxpose.xlu1.b32.end [16/16] %v201_v30, 128  ;;  %217 = vxpose.xlu0.b32.end [16/16] %v200_v31, 128 }
  0xbb   : > { %v250_v32 = vpop.trf.xlu1  ;;  %v218_v33 = vpop.trf.xlu0 }
  0xbc   : > { %282 = vst [vmem:[%s779_s18 + $0x80] sm:$0xff] %v250_v32  ;;  %266 = vst [vmem:[%s779_s18] sm:$0xff] %v218_v33 }
  0xbf   : > { %v251_v34 = vpop.trf.xlu1  ;;  %v219_v35 = vpop.trf.xlu0 }
  0xc0   : > { %283 = vst [vmem:[%s779_s18 + $0x88] sm:$0xff] %v251_v34  ;;  %267 = vst [vmem:[%s779_s18 + $0x8] sm:$0xff] %v219_v35 }
  0xc3   : > { %v252_v36 = vpop.trf.xlu1  ;;  %v220_v37 = vpop.trf.xlu0 }
  0xc4   : > { %284 = vst [vmem:[%s779_s18 + $0x90] sm:$0xff] %v252_v36  ;;  %268 = vst [vmem:[%s779_s18 + $0x10] sm:$0xff] %v220_v37 }
  0xc7   : > { %v253_v38 = vpop.trf.xlu1  ;;  %v221_v39 = vpop.trf.xlu0 }
  0xc8   : > { %285 = vst [vmem:[%s779_s18 + $0x98] sm:$0xff] %v253_v38  ;;  %269 = vst [vmem:[%s779_s18 + $0x18] sm:$0xff] %v221_v39 }
  0xcb   : > { %v254_v40 = vpop.trf.xlu1  ;;  %v222_v41 = vpop.trf.xlu0 }
  0xcc   : > { %286 = vst [vmem:[%s779_s18 + $0xa0] sm:$0xff] %v254_v40  ;;  %270 = vst [vmem:[%s779_s18 + $0x20] sm:$0xff] %v222_v41 }
  0xcf   : > { %v255_v42 = vpop.trf.xlu1  ;;  %v223_v43 = vpop.trf.xlu0 }
  0xd0   : > { %287 = vst [vmem:[%s779_s18 + $0xa8] sm:$0xff] %v255_v42  ;;  %271 = vst [vmem:[%s779_s18 + $0x28] sm:$0xff] %v223_v43 }
  0xd3   : > { %v256_v44 = vpop.trf.xlu1  ;;  %v224_v45 = vpop.trf.xlu0 }
  0xd4   : > { %288 = vst [vmem:[%s779_s18 + $0xb0] sm:$0xff] %v256_v44  ;;  %272 = vst [vmem:[%s779_s18 + $0x30] sm:$0xff] %v224_v45 }
  0xd7   : > { %v257_v46 = vpop.trf.xlu1  ;;  %v225_v47 = vpop.trf.xlu0 }
  0xd8   : > { %289 = vst [vmem:[%s779_s18 + $0xb8] sm:$0xff] %v257_v46  ;;  %273 = vst [vmem:[%s779_s18 + $0x38] sm:$0xff] %v225_v47 }
  0xdb   : > { %v258_v48 = vpop.trf.xlu1  ;;  %v226_v49 = vpop.trf.xlu0 }
  0xdc   : > { %290 = vst [vmem:[%s779_s18 + $0xc0] sm:$0xff] %v258_v48  ;;  %274 = vst [vmem:[%s779_s18 + $0x40] sm:$0xff] %v226_v49 }
  0xdf   : > { %v259_v50 = vpop.trf.xlu1  ;;  %v227_v51 = vpop.trf.xlu0 }
  0xe0   : > { %291 = vst [vmem:[%s779_s18 + $0xc8] sm:$0xff] %v259_v50  ;;  %275 = vst [vmem:[%s779_s18 + $0x48] sm:$0xff] %v227_v51 }
  0xe3   : > { %v260_v52 = vpop.trf.xlu1  ;;  %v228_v53 = vpop.trf.xlu0 }
  0xe4   : > { %292 = vst [vmem:[%s779_s18 + $0xd0] sm:$0xff] %v260_v52  ;;  %276 = vst [vmem:[%s779_s18 + $0x50] sm:$0xff] %v228_v53 }
  0xe7   : > { %v261_v54 = vpop.trf.xlu1  ;;  %v229_v55 = vpop.trf.xlu0 }
  0xe8   : > { %293 = vst [vmem:[%s779_s18 + $0xd8] sm:$0xff] %v261_v54  ;;  %277 = vst [vmem:[%s779_s18 + $0x58] sm:$0xff] %v229_v55 }
  0xeb   : > { %v262_v56 = vpop.trf.xlu1  ;;  %v230_v57 = vpop.trf.xlu0 }
  0xec   : > { %294 = vst [vmem:[%s779_s18 + $0xe0] sm:$0xff] %v262_v56  ;;  %278 = vst [vmem:[%s779_s18 + $0x60] sm:$0xff] %v230_v57 }
  0xef   : > { %v263_v58 = vpop.trf.xlu1  ;;  %v231_v59 = vpop.trf.xlu0 }
  0xf0   : > { %295 = vst [vmem:[%s779_s18 + $0xe8] sm:$0xff] %v263_v58  ;;  %279 = vst [vmem:[%s779_s18 + $0x68] sm:$0xff] %v231_v59 }
  0xf3   : > { %v264_v60 = vpop.trf.xlu1  ;;  %v232_v61 = vpop.trf.xlu0 }
  0xf4   : > { %296 = vst [vmem:[%s779_s18 + $0xf0] sm:$0xff] %v264_v60  ;;  %280 = vst [vmem:[%s779_s18 + $0x70] sm:$0xff] %v232_v61 }
  0xf7   : > { %v265_v62 = vpop.trf.xlu1  ;;  %v233_v63 = vpop.trf.xlu0 }
  0xf8   : > { %297 = vst [vmem:[%s779_s18 + $0xf8] sm:$0xff] %v265_v62  ;;  %281 = vst [vmem:[%s779_s18 + $0x78] sm:$0xff] %v233_v63 }
  0xf9   : > { %534 = shalt.err (!%p531_p5)
}
  0xfa   : > { %s535_s17 = scalar_lea.hbm %s816_s5, 4096  ;;  %s539_s24 = scalar_lea.hbm %s870_s1, 8192 }
  0xfb   : > { %p536_p4 = scmp.ne.s32.totalorder %s816_s5, %s535_s17  ;;  %p540_p12 = scmp.lt.u32.totalorder %s816_s5, %s870_s1 }
  0xfc   : > { %p541_p1 = scmp.lt.u32.totalorder %s539_s24, %s535_s17  ;;  %p543_p8 = scmp.lt.u32.totalorder %s535_s17, %s816_s5 }
  0xfd   : > { %p537_p7 = pnand %p536_p4, %p878_p9 }
  0xfe   : > { %p542_p3 = por %p541_p1, %p540_p12 }
  0xff   : > { %p538_p10 = pneg %p537_p7 }
 0x100   : > { %p544_p11 = por %p543_p8, %p542_p3 }
 0x102   : > { %p545_p0 = pnand %p544_p11, %p538_p10 }
 0x104   : > { %548 = shalt.err (!%p545_p0)
}
 0x105   : > { %s609_s3 = smov 128   ;;  %s610_s4 = smov 8  }
 0x106   : > { %427 = dma.vmem_to_hbm [thread:$0]  (%p878_p9), %s818_s29, 4096, %s816_s5, %s299_s9, %s609_s3, %s609_s3, %s610_s4  }
 0x107 PF: > { %s330_s18 = sand.u32 1, %s583_s6   ;;  %p879_p6 = scmp.ne.s32.totalorder %s875_s21, 0 }
 0x108   : > { %p880_p13 = scmp.ge.s32.totalorder %s603_s11, 2  ;;  %s331_s27 = scalar_lea.sflag [#allocation4], %s330_s18 }
 0x10a   : > { %p434_p2 = pnand %p880_p13, %p879_p6 }
 0x10c   : > { %578 = dma.done.wait (!%p434_p2), %s331_s27, 4096  }
 0x10d   : > { %580 = vsyncadd (!%p434_p2), %s331_s27, 4294963200  ;;  %s17_s11 = sadd.s32 1, %s603_s11   ;;  %s881_s6 = smov %s587_s7 }
 0x10e   : > { %p14_p5 = scmp.ge.s32.totalorder %s17_s11, 4   ;;  %s882_s7 = smov %s591_s8 }
 0x10f   : > { %s883_s8 = smov %s677_s20  ;;  %s884_s9 = smov %s599_s10 }
 0x110   : > { %s885_s10 = smov %s887_s14  ;;  %16 = sbr.rel (!%p14_p5) target bundleno = 6 (0x6), region = 69 }
 0x117   :  { %336 = vsyncpa [#allocation3], 1 }
 0x118   :  { %338 = vsyncpa [#allocation3 + $0x1], 1 }
 0x119   :  { %339 = vsyncpa [#allocation4], 1 }
 0x11a   :  { %341 = vsyncpa [#allocation4 + $0x1], 1 }

</bundles_post_ra>
